<compile_context>
chip_gen: v7x
topology: tpu7x:2x2x1
jax: 0.10.0
libtpu: 0.0.40
codegen_flags: <defaults>
</compile_context>

<pallas_src>
import functools
import math

import jax
import jax.numpy as jnp
from jax.experimental import pallas as pl
from jax.experimental.pallas import tpu as pltpu

OMEGA = 14.0
THETA = 0.5
EPSILON = 1.0
ALPHA = 2.1

LANES = 128
SUBLANES = 8
MAX_BLOCK_ROWS = 4096   # (4096,128) f32 block = 2 MiB/buffer
MAX_SPLITS = 2          # outer "parallel" axis -> both TCs on dual-core chips


def _awing_kernel(pred_ref, tgt_ref, out_ref, *,
                  omega, theta, epsilon, alpha,
                  blocks_per_split, valid_rows, need_mask):
    """Elementwise AWing loss; accumulate (8,128) partial sums per split."""
    split = pl.program_id(0)
    step = pl.program_id(1)

    @pl.when(step == 0)
    def _():
        out_ref[...] = jnp.zeros_like(out_ref)

    y_hat = pred_ref[...].astype(jnp.float32)
    y = tgt_ref[...].astype(jnp.float32)

    delta = jnp.abs(y - y_hat)
    a_minus_y = alpha - y
    in_branch1 = delta < theta

    # Single exp serving both branches (argument select):
    #   u == (delta/omega)^(alpha-y)   when delta <  theta
    #   u == (theta/eps)^(alpha-y)     when delta >= theta
    # log(0) = -inf and a_minus_y >= alpha-1 > 0, so exp(-inf) == 0 exactly
    # reproduces pow(0, alpha-y) == 0 for zero-padded tail elements.
    log_d = jnp.log(delta * (1.0 / omega))
    log_c = math.log(theta / epsilon)        # constant-folded at trace time
    u = jnp.exp(a_minus_y * jnp.where(in_branch1, log_d, log_c))

    # Branch-2 linear coefficient (exact algebra, third pow removed):
    #   A = omega * 1/(1+u) * (alpha-y) * (theta/eps)^(alpha-y-1) * 1/eps
    #     = (omega/theta) * (alpha-y) * u / (1+u)
    inv1pu = pl.reciprocal(1.0 + u, approx=True)
    inv1pu = inv1pu * (2.0 - (1.0 + u) * inv1pu)   # one Newton step -> ~f32 exact
    A = (omega / theta) * a_minus_y * u * inv1pu

    # loss1 = omega*log1p(u)
    # loss2 = A*(delta - theta) + omega*log1p(u)       (C folded in)
    loss = omega * jnp.log1p(u) + jnp.where(in_branch1, 0.0, A * (delta - theta))

    block_rows = pred_ref.shape[0]

    def _accum(vals):
        # Sublane-group (VALU) reduce to a full (8,128) tile; unmasked store.
        out_ref[...] += jnp.sum(vals.reshape(-1, SUBLANES, LANES), axis=0)

    if need_mask:
        base = (split * blocks_per_split + step) * block_rows
        needs_mask_now = base + block_rows > valid_rows

        @pl.when(needs_mask_now)
        def _():
            # Ragged last block / clamped duplicate blocks: zero invalid rows.
            # jnp.where is a true select, so NaN/Inf garbage rows are dropped.
            row_id = base + jax.lax.broadcasted_iota(
                jnp.int32, (block_rows, 1), 0)
            _accum(jnp.where(row_id < valid_rows, loss, 0.0))

        @pl.when(jnp.logical_not(needs_mask_now))
        def _():
            _accum(loss)
    else:
        _accum(loss)


def adaptive_wing_loss(pred, target, *, omega=OMEGA, theta=THETA,
                       epsilon=EPSILON, alpha=ALPHA):
    assert pred.shape == target.shape
    n_elems = pred.size

    pred_f = pred.reshape(-1)
    tgt_f = target.reshape(-1)

    # Tail-pad only to an (8,128)-tile multiple (<=1023 extra elements).
    # Padded zeros contribute exactly 0: delta=0 < theta and exp(-inf)=0.
    pad = (-n_elems) % (SUBLANES * LANES)
    if pad:
        pred_f = jnp.pad(pred_f, (0, pad))
        tgt_f = jnp.pad(tgt_f, (0, pad))
    rows = (n_elems + pad) // LANES
    pred2d = pred_f.reshape(rows, LANES)
    tgt2d = tgt_f.reshape(rows, LANES)

    block_rows = min(MAX_BLOCK_ROWS, rows)          # always a multiple of 8
    nblocks = (rows + block_rows - 1) // block_rows
    num_splits = min(MAX_SPLITS, nblocks)
    blocks_per_split = (nblocks + num_splits - 1) // num_splits
    # Masking only needed if there is a ragged last block or a clamped
    # duplicate block on the second split; otherwise compile it out entirely.
    need_mask = (rows % block_rows != 0) or (num_splits * blocks_per_split != nblocks)

    def in_map(p, i):
        # Clamp so every grid point maps to an existing block; overshoot
        # blocks are fully zeroed by the in-kernel row mask.
        return (jnp.minimum(p * blocks_per_split + i, nblocks - 1), 0)

    kernel = functools.partial(
        _awing_kernel,
        omega=float(omega), theta=float(theta),
        epsilon=float(epsilon), alpha=float(alpha),
        blocks_per_split=blocks_per_split, valid_rows=rows,
        need_mask=need_mask)

    elems = rows * LANES
    cost = pl.CostEstimate(
        flops=20 * elems,
        transcendentals=4 * elems,
        bytes_accessed=2 * 4 * elems + num_splits * SUBLANES * LANES * 4)

    partials = pl.pallas_call(
        kernel,
        out_shape=jax.ShapeDtypeStruct((num_splits * SUBLANES, LANES),
                                       jnp.float32),
        grid_spec=pltpu.PrefetchScalarGridSpec(
            num_scalar_prefetch=0,
            grid=(num_splits, blocks_per_split),
            in_specs=[
                pl.BlockSpec((block_rows, LANES), in_map),
                pl.BlockSpec((block_rows, LANES), in_map),
            ],
            out_specs=pl.BlockSpec((SUBLANES, LANES), lambda p, i: (p, 0)),
        ),
        compiler_params=pltpu.CompilerParams(
            dimension_semantics=("parallel", "arbitrary")),
        cost_estimate=cost,
    )(pred2d, tgt2d)

    # Every element falls in exactly one branch -> denominator = element count.
    return jnp.sum(partials) / jnp.float32(n_elems)


def _reference(pred, target, *, omega=OMEGA, theta=THETA,
               epsilon=EPSILON, alpha=ALPHA):
    y = target.astype(jnp.float32)
    y_hat = pred.astype(jnp.float32)
    delta = jnp.abs(y - y_hat)
    loss1 = omega * jnp.log1p(jnp.power(delta / omega, alpha - y))
    pow_ay = jnp.power(theta / epsilon, alpha - y)
    A = (omega * (1.0 / (1.0 + pow_ay)) * (alpha - y)
         * jnp.power(theta / epsilon, alpha - y - 1.0) * (1.0 / epsilon))
    C = theta * A - omega * jnp.log1p(pow_ay)
    loss2 = A * delta - C
    loss = jnp.where(delta < theta, loss1, loss2)
    return jnp.sum(loss) / jnp.float32(pred.size)


if __name__ == "__main__":
    key = jax.random.PRNGKey(0)
    k1, k2 = jax.random.split(key)
    # pred/target: BxNxHxH heatmaps, target in [0, 1]
    B, N, H = 2, 4, 16
    pred = jax.random.normal(k1, (B, N, H, H), dtype=jnp.float32) * 0.5
    target = jax.random.uniform(k2, (B, N, H, H), dtype=jnp.float32)

    out = adaptive_wing_loss(pred, target)
    out = jax.block_until_ready(out)

    ref = _reference(pred, target)
    assert jnp.allclose(out, ref, rtol=1e-5, atol=1e-5), (out, ref)
    print("KERNEL_OK")
</pallas_src>

<mosaic_0001>
module attributes {stable_mosaic.version = 11 : i64} {
  func.func @_awing_kernel(%arg0: i32, %arg1: i32, %arg2: memref<16x128xf32, #tpu.memory_space<vmem>>, %arg3: memref<16x128xf32, #tpu.memory_space<vmem>>, %arg4: memref<8x128xf32, #tpu.memory_space<vmem>>) attributes {dimension_semantics = [#tpu.dimension_semantics<parallel>, #tpu.dimension_semantics<arbitrary>], iteration_bounds = array<i64: 1, 1>, scalar_prefetch = 0 : i64, scratch_operands = 0 : i64, tpu.core_type = #tpu.core_type<tc>, window_params = [{transform_indices = @transform_0, window_bounds = array<i64: 16, 128>}, {transform_indices = @transform_1, window_bounds = array<i64: 16, 128>}, {transform_indices = @transform_2, window_bounds = array<i64: 8, 128>}]} {
    %c0_i32 = arith.constant 0 : i32
    %0 = arith.cmpi eq, %arg1, %c0_i32 : i32
    %1 = arith.extui %0 : i1 to i32
    %c0_i32_0 = arith.constant 0 : i32
    %2 = arith.cmpi ne, %1, %c0_i32_0 : i32
    scf.if %2 {
      %cst_19 = arith.constant 0.000000e+00 : f32
      %45 = vector.broadcast %cst_19 : f32 to vector<8x128xf32>
      %c0_20 = arith.constant 0 : index
      %c0_21 = arith.constant 0 : index
      %46 = vector.load %arg4[%c0_20, %c0_21] : memref<8x128xf32, #tpu.memory_space<vmem>>, vector<8x128xf32>
      tpu.vector_store %arg4[%c0_20, %c0_21], %45 {strides = array<i32>} : memref<8x128xf32, #tpu.memory_space<vmem>>, vector<8x128xf32>,
    } else {
    }
    %c0 = arith.constant 0 : index
    %c0_1 = arith.constant 0 : index
    %3 = vector.load %arg2[%c0, %c0_1] : memref<16x128xf32, #tpu.memory_space<vmem>>, vector<16x128xf32>
    %c0_2 = arith.constant 0 : index
    %c0_3 = arith.constant 0 : index
    %4 = vector.load %arg3[%c0_2, %c0_3] : memref<16x128xf32, #tpu.memory_space<vmem>>, vector<16x128xf32>
    %5 = arith.subf %4, %3 : vector<16x128xf32>
    %6 = math.absf %5 : vector<16x128xf32>
    %cst = arith.constant 2.100000e+00 : f32
    %7 = vector.broadcast %cst : f32 to vector<16x128xf32>
    %8 = arith.subf %7, %4 : vector<16x128xf32>
    %cst_4 = arith.constant 5.000000e-01 : f32
    %9 = vector.broadcast %cst_4 : f32 to vector<16x128xf32>
    %10 = arith.cmpf olt, %6, %9 : vector<16x128xf32>
    %cst_5 = arith.constant 0.0714285746 : f32
    %11 = vector.broadcast %cst_5 : f32 to vector<16x128xf32>
    %12 = arith.mulf %6, %11 : vector<16x128xf32>
    %13 = math.log %12 : vector<16x128xf32>
    %cst_6 = arith.constant -0.693147182 : f32
    %14 = vector.broadcast %cst_6 : f32 to vector<16x128xf32>
    %15 = arith.select %10, %13, %14 : vector<16x128xi1>, vector<16x128xf32>
    %16 = arith.mulf %8, %15 : vector<16x128xf32>
    %17 = math.exp %16 : vector<16x128xf32>
    %cst_7 = arith.constant 1.000000e+00 : f32
    %18 = vector.broadcast %cst_7 : f32 to vector<16x128xf32>
    %19 = arith.addf %18, %17 : vector<16x128xf32>
    %20 = tpu.reciprocal %19 {approx = true} : vector<16x128xf32> -> vector<16x128xf32>
    %cst_8 = arith.constant 1.000000e+00 : f32
    %21 = vector.broadcast %cst_8 : f32 to vector<16x128xf32>
    %22 = arith.addf %21, %17 : vector<16x128xf32>
    %23 = arith.mulf %22, %20 : vector<16x128xf32>
    %cst_9 = arith.constant 2.000000e+00 : f32
    %24 = vector.broadcast %cst_9 : f32 to vector<16x128xf32>
    %25 = arith.subf %24, %23 : vector<16x128xf32>
    %26 = arith.mulf %20, %25 : vector<16x128xf32>
    %cst_10 = arith.constant 2.800000e+01 : f32
    %27 = vector.broadcast %cst_10 : f32 to vector<16x128xf32>
    %28 = arith.mulf %27, %8 : vector<16x128xf32>
    %29 = arith.mulf %28, %17 : vector<16x128xf32>
    %30 = arith.mulf %29, %26 : vector<16x128xf32>
    %31 = math.log1p %17 : vector<16x128xf32>
    %cst_11 = arith.constant 1.400000e+01 : f32
    %32 = vector.broadcast %cst_11 : f32 to vector<16x128xf32>
    %33 = arith.mulf %32, %31 : vector<16x128xf32>
    %cst_12 = arith.constant 5.000000e-01 : f32
    %34 = vector.broadcast %cst_12 : f32 to vector<16x128xf32>
    %35 = arith.subf %6, %34 : vector<16x128xf32>
    %36 = arith.mulf %30, %35 : vector<16x128xf32>
    %cst_13 = arith.constant 0.000000e+00 : f32
    %37 = vector.broadcast %cst_13 : f32 to vector<16x128xf32>
    %38 = arith.select %10, %37, %36 : vector<16x128xi1>, vector<16x128xf32>
    %39 = arith.addf %33, %38 : vector<16x128xf32>
    %c0_14 = arith.constant 0 : index
    %c0_15 = arith.constant 0 : index
    %40 = vector.load %arg4[%c0_14, %c0_15] : memref<8x128xf32, #tpu.memory_space<vmem>>, vector<8x128xf32>
    %41 = vector.shape_cast %39 : vector<16x128xf32> to vector<2x8x128xf32>
    %cst_16 = arith.constant dense<0.000000e+00> : vector<8x128xf32>
    %42 = vector.multi_reduction <add>, %41, %cst_16 [0] : vector<2x8x128xf32> to vector<8x128xf32>
    %43 = arith.addf %40, %42 : vector<8x128xf32>
    %c0_17 = arith.constant 0 : index
    %c0_18 = arith.constant 0 : index
    %44 = vector.load %arg4[%c0_17, %c0_18] : memref<8x128xf32, #tpu.memory_space<vmem>>, vector<8x128xf32>
    tpu.vector_store %arg4[%c0_17, %c0_18], %43 {strides = array<i32>} : memref<8x128xf32, #tpu.memory_space<vmem>>, vector<8x128xf32>,
    return
  }
  func.func @transform_0(%arg0: i32, %arg1: i32) -> (i32, i32) {
    %c1_i32 = arith.constant 1 : i32
    %0 = arith.muli %arg0, %c1_i32 : i32
    %1 = arith.addi %0, %arg1 : i32
    %c0_i32 = arith.constant 0 : i32
    %2 = arith.minsi %1, %c0_i32 : i32
    %c0_i32_0 = arith.constant 0 : i32
    %c0_i32_1 = arith.constant 0 : i32
    return %2, %c0_i32_0 : i32, i32
  }
  func.func @transform_1(%arg0: i32, %arg1: i32) -> (i32, i32) {
    %c1_i32 = arith.constant 1 : i32
    %0 = arith.muli %arg0, %c1_i32 : i32
    %1 = arith.addi %0, %arg1 : i32
    %c0_i32 = arith.constant 0 : i32
    %2 = arith.minsi %1, %c0_i32 : i32
    %c0_i32_0 = arith.constant 0 : i32
    %c0_i32_1 = arith.constant 0 : i32
    return %2, %c0_i32_0 : i32, i32
  }
  func.func @transform_2(%arg0: i32, %arg1: i32) -> (i32, i32) {
    %c0_i32 = arith.constant 0 : i32
    %c0_i32_0 = arith.constant 0 : i32
    return %arg0, %c0_i32 : i32, i32
  }
}

</mosaic_0001>

<bundles_post_ra>
// kernel: tpu_custom_call.1
= control target key start
LH: loop header
LB: loop body
LE: loop exit
PB: predicated region body
PF: predicated region fallthrough
CT: control target
= control target key end

     0   :  { %7 = vsyncpa [#allocation3], 0  ;;  %s335_s0 = inlined_call_operand.hbm [shape: f32[16,128], index: 0, kind: input, shape index: {}]   ;;  %s336_s1 = inlined_call_operand.hbm [shape: f32[16,128], index: 1, kind: input, shape index: {}]   ;;  %s337_s2 = inlined_call_operand.hbm [shape: f32[8,128], index: 2, kind: output, shape index: {}]  }
   0x1   :  { %8 = vsyncpa [#allocation6], 0 }
   0x2   :  { %9 = vsyncpa [#allocation4], 0  ;;  %s255_s9 = smov [#allocation2]   ;;  %s183_s13 = scalar_lea.hbm %s335_s0, 256 }
   0x3   :  { %s21_s10 = sshll.u32 %s255_s9, 4  ;;  %p184_p0 = scmp.ne.s32.totalorder %s335_s0, %s183_s13  ;;  %s22_s10 = int_to_ptr.vmem [resolvable:$true] %s21_s10 }
   0x4   :  { %p187_p1 = scmp.lt.u32.totalorder %s183_s13, %s335_s0 }
   0x6   :  { %p189_p2 = pnand %p187_p1, %p184_p0 }
   0x8   :  { %192 = shalt.err (!%p189_p2)
}
   0x9   :  { %s193_s18 = scalar_lea.vmem %s22_s10, 256  ;;  %p198_p4 = scmp.lt.s32.totalorder %s22_s10, %s22_s10 }
   0xa   :  { %p194_p3 = scmp.ne.s32.totalorder %s22_s10, %s193_s18  ;;  %p199_p5 = scmp.lt.s32.totalorder %s193_s18, %s193_s18 }
   0xc   :  { %p200_p6 = por %p199_p5, %p198_p4 }
   0xe   :  { %p201_p7 = pnand %p200_p6, %p194_p3 }
  0x10   :  { %204 = shalt.err (!%p201_p7)
}
  0x11   :  { %s256_s19 = smov 128   ;;  %s257_s20 = smov 8  }
  0x12   :  { %27 = dma.hbm_to_vmem [thread:$0]  %s335_s0, 256, %s22_s10, [#allocation3], %s256_s19, %s256_s19, %s257_s20  }
  0x13   :  { %s258_s23 = smov [#allocation5]   ;;  %s205_s27 = scalar_lea.hbm %s336_s1, 256 }
  0x14   :  { %s39_s24 = sshll.u32 %s258_s23, 4  ;;  %p206_p8 = scmp.ne.s32.totalorder %s336_s1, %s205_s27  ;;  %s40_s24 = int_to_ptr.vmem [resolvable:$true] %s39_s24 }
  0x15   :  { %p209_p9 = scmp.lt.u32.totalorder %s205_s27, %s336_s1 }
  0x17   :  { %p211_p10 = pnand %p209_p9, %p206_p8 }
  0x19   :  { %214 = shalt.err (!%p211_p10)
}
  0x1a   :  { %s215_s4 = scalar_lea.vmem %s40_s24, 256  ;;  %p220_p12 = scmp.lt.s32.totalorder %s40_s24, %s40_s24 }
  0x1b   :  { %p216_p11 = scmp.ne.s32.totalorder %s40_s24, %s215_s4  ;;  %p221_p13 = scmp.lt.s32.totalorder %s215_s4, %s215_s4 }
  0x1d   :  { %p222_p0 = por %p221_p13, %p220_p12 }
  0x1f   :  { %p223_p1 = pnand %p222_p0, %p216_p11 }
  0x21   :  { %226 = shalt.err (!%p223_p1)
}
  0x22   :  { %45 = dma.hbm_to_vmem [thread:$0]  %s336_s1, 256, %s40_s24, [#allocation6], %s256_s19, %s256_s19, %s257_s20  }
  0x23   :  { %249 = dma.done.wait [#allocation3], 256  }
  0x24   :  { %250 = vsyncadd [#allocation3], 4294967040 }
  0x25   :  { %251 = dma.done.wait [#allocation6], 256  }
  0x26   :  { %252 = vsyncadd [#allocation6], 4294967040  ;;  %v65_v0 = vld [vmem:[#allocation2] sm:$0xff]  ;;  %v66_v1 = vld [vmem:[#allocation2 + $0x8] sm:$0xff]  ;;  %s259_s1 = smov [#allocation7]  }
  0x27   :  { %v67_v2 = vld [vmem:[#allocation5] sm:$0xff]  ;;  %v68_v3 = vld [vmem:[#allocation5 + $0x8] sm:$0xff]  ;;  %s145_s6 = sshll.u32 %s259_s1, 4  ;;  %s146_s6 = int_to_ptr.vmem [resolvable:$true] %s145_s6 }
  0x28   :  { %v69_v4 = vsub.f32 %v67_v2, %v65_v0  ;;  %v70_v5 = vsub.f32 %v68_v3, %v66_v1  ;;  %v73_v11 = vsub.f32 2.1, %v67_v2  ;;  %v74_v13 = vsub.f32 2.1, %v68_v3  ;;  %s227_s7 = scalar_lea.vmem %s146_s6, 128  ;;  %p232_p3 = scmp.lt.s32.totalorder %s146_s6, %s146_s6 }
  0x29   :  { %p228_p2 = scmp.ne.s32.totalorder %s146_s6, %s227_s7  ;;  %p233_p4 = scmp.lt.s32.totalorder %s227_s7, %s227_s7 }
  0x2a   :  { %v299_v6 = vand.u32 2147483647, %v69_v4  ;;  %v301_v7 = vand.u32 2147483647, %v70_v5  ;;  %v101_v31 = vmul.f32 28.0, %v73_v11  ;;  %v102_v34 = vmul.f32 28.0, %v74_v13 }
  0x2b   :  { %p234_p5 = por %p233_p4, %p232_p3 }
  0x2c   :  { %v77_v8 = vmul.f32 0.071428575, %v299_v6  ;;  %v78_v9 = vmul.f32 0.071428575, %v301_v7  ;;  %vm75_vm0 = vcmp.lt.f32.partialorder %v299_v6, 0.5  ;;  %vm76_vm1 = vcmp.lt.f32.partialorder %v301_v7, 0.5 }
  0x2d   :  { %v159_v51 = vadd.f32 -0.5, %v299_v6  ;;  %v160_v54 = vadd.f32 -0.5, %v301_v7  ;;  %p235_p6 = pnand %p234_p5, %p228_p2 }
  0x2e   :  { %167 = vlog2.f32 %v77_v8 }
  0x2f   :  { %169 = vlog2.f32 %v78_v9 }
  0x38   :  { %v168_v10 = vpop.eup %167 }
  0x39   :  { %v170_v12 = vpop.eup %169  ;;  %v80_v14 = vmul.f32 0.6931472, %v168_v10 }
  0x3a   :  { %v82_v15 = vmul.f32 0.6931472, %v170_v12 }
  0x3b   :  { %v83_v16 = vsel %vm75_vm0, %v80_v14, -0.6931472 }
  0x3c   :  { %v84_v17 = vsel %vm76_vm1, %v82_v15, -0.6931472  ;;  %v85_v18 = vmul.f32 %v83_v16, %v73_v11 }
  0x3d   :  { %v86_v19 = vmul.f32 %v84_v17, %v74_v13 }
  0x3e   :  { %v87_v20 = vmul.f32 1.442695, %v85_v18 }
  0x3f   :  { %v89_v21 = vmul.f32 1.442695, %v86_v19 }
  0x40   :  { %171 = vpow2.f32 %v87_v20 }
  0x41   :  { %173 = vpow2.f32 %v89_v21 }
  0x4a   :  { %v172_v22 = vpop.eup %171 }
  0x4b   :  { %v174_v23 = vpop.eup %173  ;;  %v91_v24 = vadd.f32 1.0, %v172_v22  ;;  %v110_v26 = vmul.f32 -0.5, %v172_v22  ;;  %v113_v29 = vand.u32 2147483647, %v172_v22  ;;  %v103_v44 = vmul.f32 %v172_v22, %v101_v31 }
  0x4c   :  { %v92_v25 = vadd.f32 1.0, %v174_v23  ;;  %v119_v27 = vmul.f32 -0.5, %v174_v23  ;;  %v122_v32 = vand.u32 2147483647, %v174_v23  ;;  %v104_v47 = vmul.f32 %v174_v23, %v102_v34 }
  0x4d   :  { %175 = vrcp.f32 %v91_v24  ;;  %v111_v28 = vadd.f32 1.0, %v110_v26  ;;  %vm311_vm2 = vcmp.lt.f32.partialorder %v113_v29, 0.0004427343 }
  0x4e   :  { %177 = vrcp.f32 %v92_v25  ;;  %v120_v30 = vadd.f32 1.0, %v119_v27  ;;  %vm123_vm3 = vcmp.lt.f32.partialorder %v122_v32, 0.0004427343 }
  0x4f   :  { %179 = vlog2.f32 %v91_v24  ;;  %v112_v37 = vmul.f32 %v172_v22, %v111_v28 }
  0x50   :  { %181 = vlog2.f32 %v92_v25  ;;  %v121_v41 = vmul.f32 %v174_v23, %v120_v30 }
  0x57   :  { %v176_v33 = vpop.eup %175 }
  0x58   :  { %v178_v35 = vpop.eup %177  ;;  %v95_v36 = vmul.f32 %v176_v33, %v91_v24 }
  0x59   :  { %v180_v38 = vpop.eup %179  ;;  %v96_v39 = vmul.f32 %v178_v35, %v92_v25 }
  0x5a   :  { %v182_v42 = vpop.eup %181  ;;  %v97_v43 = vsub.f32 2.0, %v95_v36  ;;  %v109_v45 = vmul.f32 0.6931472, %v180_v38 }
  0x5b   :  { %v98_v46 = vsub.f32 2.0, %v96_v39  ;;  %v118_v48 = vmul.f32 0.6931472, %v182_v42 }
  0x5c   :  { %v99_v49 = vmul.f32 %v176_v33, %v97_v43  ;;  %v115_v50 = vsel %vm311_vm2, %v112_v37, %v109_v45 }
  0x5d   :  { %v100_v52 = vmul.f32 %v178_v35, %v98_v46  ;;  %v124_v53 = vsel %vm123_vm3, %v121_v41, %v118_v48  ;;  %v125_v57 = vmul.f32 14.0, %v115_v50 }
  0x5e   :  { %v105_v55 = vmul.f32 %v103_v44, %v99_v49  ;;  %v126_v58 = vmul.f32 14.0, %v124_v53 }
  0x5f   :  { %v106_v56 = vmul.f32 %v104_v47, %v100_v52 }
  0x60   :  { %v129_v59 = vmul.f32 %v159_v51, %v105_v55 }
  0x61   :  { %v130_v60 = vmul.f32 %v160_v54, %v106_v56 }
  0x62   :  { %v131_v61 = vsel %vm75_vm0, 0.0, %v129_v59 }
  0x63   :  { %v132_v62 = vsel %vm76_vm1, 0.0, %v130_v60  ;;  %v133_v63 = vadd.f32 %v131_v61, %v125_v57 }
  0x64   :  { %v134_v0 = vadd.f32 %v132_v62, %v126_v58 }
  0x66   :  { %v136_v1 = vadd.f32 %v134_v0, %v133_v63 }
  0x68   :  { %138 = vst [vmem:[#allocation7] sm:$0xff] %v136_v1 }
  0x69   :  { %238 = shalt.err (!%p235_p6)
}
  0x6a   :  { %s239_s10 = scalar_lea.hbm %s337_s2, 128 }
  0x6b   :  { %p240_p7 = scmp.ne.s32.totalorder %s337_s2, %s239_s10  ;;  %p243_p8 = scmp.lt.u32.totalorder %s239_s10, %s337_s2 }
  0x6d   :  { %p245_p9 = pnand %p243_p8, %p240_p7 }
  0x6f   :  { %248 = shalt.err (!%p245_p9)
}
  0x70   :  { %148 = dma.vmem_to_hbm [thread:$0]  %s146_s6, 128, %s337_s2, [#allocation4]  }
  0x71   :  { %253 = dma.done.wait [#allocation4], 128  }
  0x72   :  { %254 = vsyncadd [#allocation4], 4294967168 }
  0x73   :  { %152 = vsyncpa [#allocation3], 1 }
  0x74   :  { %153 = vsyncpa [#allocation6], 1 }
  0x75   :  { %154 = vsyncpa [#allocation4], 1 }

</bundles_post_ra>
